<compile_context>
chip_gen: v5e
topology: v5e:2x2
jax: 0.10.0
libtpu: 0.0.40
codegen_flags: <defaults>
</compile_context>

<pallas_src>
import jax
import jax.numpy as jnp
from jax import lax
from jax.experimental import pallas as pl
from jax.experimental.pallas import tpu as pltpu


def _matmul_nt_kernel(a_ref, b_ref, o_ref):
    # a_ref: (S, D)  == x341 slice for one head
    # b_ref: (S, D)  == x330 slice for one head
    # o_ref: (S, S)  == a @ b^T
    # Default MXU precision is plenty for K=64 / N(0,1) inputs at 1e-4 tol;
    # switch to precision=lax.Precision.HIGHEST only if tolerances tighten.
    o_ref[...] = lax.dot_general(
        a_ref[...],
        b_ref[...],
        dimension_numbers=(((1,), (1,)), ((), ())),  # contract over D
        preferred_element_type=jnp.float32,
    ).astype(o_ref.dtype)


def transpose_matmul(x330, x341):
    """Equivalent of: x343 = x341 @ x330.transpose(-1, -2)."""
    B, H, S, D = x330.shape
    assert x341.shape == (B, H, S, D)
    BH = B * H

    a = x341.reshape(BH, S, D)
    b = x330.reshape(BH, S, D)

    # ~75 MFLOP, ~3 MiB of HBM traffic for the default shapes.
    cost = pl.CostEstimate(
        flops=2 * BH * S * S * D,
        bytes_accessed=(2 * BH * S * D + BH * S * S) * 4,
        transcendentals=0,
    )

    out = pl.pallas_call(
        _matmul_nt_kernel,
        out_shape=jax.ShapeDtypeStruct((BH, S, S), x341.dtype),
        grid_spec=pltpu.PrefetchScalarGridSpec(
            num_scalar_prefetch=0,
            grid=(BH,),  # one head per step; 4 parallel steps
            in_specs=[
                pl.BlockSpec((None, S, D), lambda i: (i, 0, 0)),
                pl.BlockSpec((None, S, D), lambda i: (i, 0, 0)),
            ],
            out_specs=pl.BlockSpec((None, S, S), lambda i: (i, 0, 0)),
        ),
        compiler_params=pltpu.CompilerParams(
            dimension_semantics=(pltpu.PARALLEL,),
        ),
        cost_estimate=cost,
    )(a, b)

    return out.reshape(B, H, S, S)


if __name__ == "__main__":
    key = jax.random.PRNGKey(0)
    k1, k2 = jax.random.split(key)

    # Shapes consistent with the module: [1, 4, 384, 64]
    B, H, S, D = 1, 4, 384, 64
    x330 = jax.random.normal(k1, (B, H, S, D), dtype=jnp.float32)
    x341 = jax.random.normal(k2, (B, H, S, D), dtype=jnp.float32)

    x343 = transpose_matmul(x330, x341)
    x343 = jax.block_until_ready(x343)

    # Reference check in plain JAX
    ref = jnp.matmul(x341, jnp.swapaxes(x330, -1, -2))
    assert x343.shape == (B, H, S, S)
    assert jnp.allclose(x343, ref, atol=1e-4, rtol=1e-4)

    print("KERNEL_OK")
</pallas_src>

<mosaic_0001>
module attributes {stable_mosaic.version = 11 : i64} {
  func.func @_matmul_nt_kernel(%arg0: i32, %arg1: memref<1x384x64xf32, #tpu.memory_space<vmem>>, %arg2: memref<1x384x64xf32, #tpu.memory_space<vmem>>, %arg3: memref<1x384x384xf32, #tpu.memory_space<vmem>>) attributes {dimension_semantics = [#tpu.dimension_semantics<parallel>], iteration_bounds = array<i64: 4>, scalar_prefetch = 0 : i64, scratch_operands = 0 : i64, tpu.core_type = #tpu.core_type<tc>, window_params = [{transform_indices = @transform_0, window_bounds = array<i64: 1, 384, 64>}, {transform_indices = @transform_1, window_bounds = array<i64: 1, 384, 64>}, {transform_indices = @transform_2, window_bounds = array<i64: 1, 384, 384>}]} {
    %c0 = arith.constant 0 : index
    %c0_0 = arith.constant 0 : index
    %c0_1 = arith.constant 0 : index
    %0 = vector.load %arg1[%c0, %c0_0, %c0_1] : memref<1x384x64xf32, #tpu.memory_space<vmem>>, vector<1x384x64xf32>
    %1 = vector.shape_cast %0 : vector<1x384x64xf32> to vector<384x64xf32>
    %c0_2 = arith.constant 0 : index
    %c0_3 = arith.constant 0 : index
    %c0_4 = arith.constant 0 : index
    %2 = vector.load %arg2[%c0_2, %c0_3, %c0_4] : memref<1x384x64xf32, #tpu.memory_space<vmem>>, vector<1x384x64xf32>
    %3 = vector.shape_cast %2 : vector<1x384x64xf32> to vector<384x64xf32>
    %cst = arith.constant dense<0.000000e+00> : vector<384x384xf32>
    %4 = tpu.matmul %1, %3, %cst {dimension_numbers = #tpu.dot_dimension_numbers<[1], [1], [0], [0], [0, 0, 1, 0], [], []>} : vector<384x64xf32>, vector<384x64xf32>, vector<384x384xf32> -> vector<384x384xf32>
    %c0_5 = arith.constant 0 : index
    %c0_6 = arith.constant 0 : index
    %c0_7 = arith.constant 0 : index
    %5 = vector.load %arg3[%c0_5, %c0_6, %c0_7] : memref<1x384x384xf32, #tpu.memory_space<vmem>>, vector<1x384x384xf32>
    %6 = vector.shape_cast %5 : vector<1x384x384xf32> to vector<384x384xf32>
    %7 = vector.shape_cast %4 : vector<384x384xf32> to vector<1x384x384xf32>
    tpu.vector_store %arg3[%c0_5, %c0_6, %c0_7], %7 {strides = array<i32>} : memref<1x384x384xf32, #tpu.memory_space<vmem>>, vector<1x384x384xf32>,
    return
  }
  func.func @transform_0(%arg0: i32) -> (i32, i32, i32) {
    %c0_i32 = arith.constant 0 : i32
    %c0_i32_0 = arith.constant 0 : i32
    %c0_i32_1 = arith.constant 0 : i32
    return %arg0, %c0_i32, %c0_i32_0 : i32, i32, i32
  }
  func.func @transform_1(%arg0: i32) -> (i32, i32, i32) {
    %c0_i32 = arith.constant 0 : i32
    %c0_i32_0 = arith.constant 0 : i32
    %c0_i32_1 = arith.constant 0 : i32
    return %arg0, %c0_i32, %c0_i32_0 : i32, i32, i32
  }
  func.func @transform_2(%arg0: i32) -> (i32, i32, i32) {
    %c0_i32 = arith.constant 0 : i32
    %c0_i32_0 = arith.constant 0 : i32
    %c0_i32_1 = arith.constant 0 : i32
    return %arg0, %c0_i32, %c0_i32_0 : i32, i32, i32
  }
}

</mosaic_0001>

<bundles_post_ra>
// kernel: tpu_custom_call.1
= control target key start
LH: loop header
LB: loop body
LE: loop exit
PB: predicated region body
PF: predicated region fallthrough
CT: control target
= control target key end

     0   :  { %7 = vsyncpa [#allocation3], 0  ;;  %s2412_s0 = inlined_call_operand.vmem [shape: f32[4,384,64], index: 0, kind: input, shape index: {}]   ;;  %s2413_s1 = inlined_call_operand.vmem [shape: f32[4,384,64], index: 1, kind: input, shape index: {}]   ;;  %s2414_s2 = inlined_call_operand.hbm [shape: f32[4,384,384], index: 2, kind: output, shape index: {}]  }
   0x1   :  { %9 = vsyncpa [#allocation3 + $0x1], 0  ;;  %s1638_s9 = smov 0   ;;  %s1640_s10 = smov 0  }
   0x2   :  { %s1642_s11 = smov 0   ;;  %s1644_s12 = smov 0  }
   0x3 LB: > { %s1659_s13 = sadd.s32 4294967295, %s1619_s12   ;;  %s1264_s14 = sadd.s32 4294967294, %s1619_s12   ;;  %s1619_s12 = sphi %s1644_s12, %s2420_s12   ;;  %s1615_s11 = sphi %s1642_s11, %s2419_s11   ;;  %s1611_s10 = sphi %s1640_s10, %s2418_s10   ;;  %s1607_s9 = sphi %s1638_s9, %s2417_s9  }
   0x4   : > { %s1663_s15 = sadd.s32 1, %s1619_s12   ;;  %s74_s16 = sadd.s32 1, %s1615_s11 }
   0x5   : > { %s71_s17 = ssub.s32 %s1619_s12, %s1663_s15  ;;  %p84_p0 = scmp.ne.s32.totalorder %s1615_s11, %s1611_s10 }
   0x6   : > { %p72_p1 = scmp.eq.s32.totalorder %s71_s17, 0  ;;  %p85_p2 = scmp.eq.s32.totalorder %s1659_s13, 3 }
   0x7   : > { %p90_p3 = scmp.ne.s32.totalorder %s1611_s10, %s1607_s9  ;;  %p91_p4 = scmp.eq.s32.totalorder %s1264_s14, 3 }
   0x8   : > { %s1674_s18 = scalar_select %p72_p1, %s1615_s11, %s74_s16  }
   0x9   : > { %p1676_p5 = por %p85_p2, %p84_p0  ;;  %p1680_p6 = por %p91_p4, %p90_p3 }
   0xa   : > { %p1267_p7 = scmp.ge.s32.totalorder %s1619_s12, 1  ;;  %p125_p8 = scmp.lt.s32.totalorder %s1619_s12, 5 }
   0xc   : > { %p126_p9 = pnand %p1267_p7, %p125_p8 }
   0xd   : > { %p152_p10 = scmp.lt.s32.totalorder (!%p126_p9), %s1659_s13, 3  ;;  %s149_s29 = sand.u32 (!%p126_p9), 1, %s1611_s10  }
   0xe   : > { %129 = sbr.rel (%p126_p9) target bundleno = 505 (0x1f9), region = 28  ;;  %s1577_s23 = scalar_lea.hbm (!%p126_p9), %s2414_s2, 4608 }
   0xf   : > { %s1513_s30 = smul.u32 (!%p126_p9), 1152, %s149_s29 }
  0x10   : > { %s1515_s4 = smul.u32 (!%p126_p9), 1152, %s1659_s13 }
  0x11   : > { %s2113_s3 = scalar_lea.vmem (!%p126_p9), [#allocation2], %s1513_s30 }
  0x12   : > { %s1186_s7 = scalar_lea.hbm (!%p126_p9), %s2414_s2, %s1515_s4  ;;  %s1187_s8 = sshll.u32 (!%p126_p9), %s2113_s3, 4  ;;  %s1188_s8 = int_to_ptr.vmem [resolvable:$true] %s1187_s8 }
  0x13   : > { %s1688_s21 = scalar_select %p152_p10, %s1659_s13, 3  ;;  %vm258_vm0 = vcmask 523264  }
  0x14   : > { %s1189_s14 = sshll.u32 %s1186_s7, 4  ;;  %s1175_s13 = scalar_lea.sflag [#allocation3], %s149_s29  ;;  %s1190_s14 = int_to_ptr.hbm [resolvable:$true] %s1189_s14 }
  0x15   : > { %s1514_s22 = smul.u32 384, %s1688_s21  ;;  %s1571_s16 = sshra.s32 %s1190_s14, 4  ;;  %s1572_s16 = int_to_ptr.hbm [resolvable:$true] %s1571_s16 }
  0x16   : > { %s1573_s17 = scalar_lea.hbm %s1572_s16, 1152  ;;  %p1578_p0 = scmp.lt.s32.totalorder %s1572_s16, %s2414_s2 }
  0x17   : > { %s1696_s25 = scalar_lea.vmem %s2413_s1, %s1514_s22  ;;  %s1902_s28 = scalar_lea.vmem %s2412_s0, %s1514_s22 }
  0x18   : > { %v225_v0 = vld [vmem:[%s1696_s25 + $0x78] sm:$0xff]  ;;  %v224_v3 = vld [vmem:[%s1696_s25 + $0x70] sm:$0xff]  ;;  %v223_v6 = vld [vmem:[%s1696_s25 + $0x68] sm:$0xff]  ;;  %p1574_p11 = scmp.ne.s32.totalorder %s1572_s16, %s1573_s17  ;;  %p1579_p1 = scmp.lt.s32.totalorder %s1577_s23, %s1573_s17 }
  0x19   : > { %v1700_v1 = vld [vmem:[%s1696_s25 + $0x178] sm:$0xff]  ;;  %1465 = vmatpush.xpose.msk.msra.mxu3 %vm258_vm0, %v225_v0  ;;  %v1710_v4 = vld [vmem:[%s1696_s25 + $0x170] sm:$0xff]  ;;  %1270 = vmatpush.xpose.msk.msra.mxu0 %vm258_vm0, %v225_v0  ;;  %v1723_v7 = vld [vmem:[%s1696_s25 + $0x168] sm:$0xff] }
  0x1a   : > { %1398 = vmatpush.xpose.msk.msra.mxu2 %vm258_vm0, %v1700_v1  ;;  %v1706_v2 = vld [vmem:[%s1696_s25 + $0xf8] sm:$0xff]  ;;  %v1716_v5 = vld [vmem:[%s1696_s25 + $0xf0] sm:$0xff]  ;;  %v1729_v8 = vld [vmem:[%s1696_s25 + $0xe8] sm:$0xff]  ;;  %p1575_p12 = pnand %p1574_p11, %p1676_p5  ;;  %p1580_p2 = por %p1579_p1, %p1578_p0 }
  0x1b   : > { %1334 = vmatpush.xpose.msk.msra.mxu1 %vm258_vm0, %v1706_v2  ;;  %v222_v9 = vld [vmem:[%s1696_s25 + $0x60] sm:$0xff]  ;;  %v221_v12 = vld [vmem:[%s1696_s25 + $0x58] sm:$0xff]  ;;  %v220_v15 = vld [vmem:[%s1696_s25 + $0x50] sm:$0xff] }
  0x1c   : > { %v1736_v10 = vld [vmem:[%s1696_s25 + $0x160] sm:$0xff]  ;;  %v1749_v13 = vld [vmem:[%s1696_s25 + $0x158] sm:$0xff]  ;;  %v1762_v16 = vld [vmem:[%s1696_s25 + $0x150] sm:$0xff]  ;;  %p1576_p13 = pneg %p1575_p12 }
  0x1d   : > { %1466 = vmatpush.xpose.msk.msra.mxu3 %vm258_vm0, %v224_v3  ;;  %1271 = vmatpush.xpose.msk.msra.mxu0 %vm258_vm0, %v224_v3  ;;  %v1742_v11 = vld [vmem:[%s1696_s25 + $0xe0] sm:$0xff]  ;;  %v1755_v14 = vld [vmem:[%s1696_s25 + $0xd8] sm:$0xff]  ;;  %v1768_v17 = vld [vmem:[%s1696_s25 + $0xd0] sm:$0xff] }
  0x1e   : > { %1399 = vmatpush.xpose.msk.msra.mxu2 %vm258_vm0, %v1710_v4  ;;  %v219_v18 = vld [vmem:[%s1696_s25 + $0x48] sm:$0xff]  ;;  %v218_v21 = vld [vmem:[%s1696_s25 + $0x40] sm:$0xff]  ;;  %v217_v24 = vld [vmem:[%s1696_s25 + $0x38] sm:$0xff]  ;;  %p1581_p3 = pnand %p1580_p2, %p1576_p13 }
  0x1f   : > { %1335 = vmatpush.xpose.msk.msra.mxu1 %vm258_vm0, %v1716_v5  ;;  %v1775_v19 = vld [vmem:[%s1696_s25 + $0x148] sm:$0xff]  ;;  %v1788_v22 = vld [vmem:[%s1696_s25 + $0x140] sm:$0xff]  ;;  %v1801_v25 = vld [vmem:[%s1696_s25 + $0x138] sm:$0xff] }
  0x20   : > { %v1781_v20 = vld [vmem:[%s1696_s25 + $0xc8] sm:$0xff]  ;;  %v1794_v23 = vld [vmem:[%s1696_s25 + $0xc0] sm:$0xff]  ;;  %v1807_v26 = vld [vmem:[%s1696_s25 + $0xb8] sm:$0xff] }
  0x21   : > { %1467 = vmatpush.xpose.msk.msra.mxu3 %vm258_vm0, %v223_v6  ;;  %1272 = vmatpush.xpose.msk.msra.mxu0 %vm258_vm0, %v223_v6  ;;  %v216_v27 = vld [vmem:[%s1696_s25 + $0x30] sm:$0xff]  ;;  %v215_v30 = vld [vmem:[%s1696_s25 + $0x28] sm:$0xff]  ;;  %v214_v33 = vld [vmem:[%s1696_s25 + $0x20] sm:$0xff] }
  0x22   : > { %1400 = vmatpush.xpose.msk.msra.mxu2 %vm258_vm0, %v1723_v7  ;;  %v1814_v28 = vld [vmem:[%s1696_s25 + $0x130] sm:$0xff]  ;;  %v1827_v31 = vld [vmem:[%s1696_s25 + $0x128] sm:$0xff]  ;;  %v1840_v34 = vld [vmem:[%s1696_s25 + $0x120] sm:$0xff] }
  0x23   : > { %1336 = vmatpush.xpose.msk.msra.mxu1 %vm258_vm0, %v1729_v8  ;;  %v1820_v29 = vld [vmem:[%s1696_s25 + $0xb0] sm:$0xff]  ;;  %v1833_v32 = vld [vmem:[%s1696_s25 + $0xa8] sm:$0xff]  ;;  %v1846_v35 = vld [vmem:[%s1696_s25 + $0xa0] sm:$0xff] }
  0x24   : > { %v213_v36 = vld [vmem:[%s1696_s25 + $0x18] sm:$0xff]  ;;  %v212_v39 = vld [vmem:[%s1696_s25 + $0x10] sm:$0xff]  ;;  %v211_v42 = vld [vmem:[%s1696_s25 + $0x8] sm:$0xff] }
  0x25   : > { %1468 = vmatpush.xpose.msk.msra.mxu3 %vm258_vm0, %v222_v9  ;;  %1273 = vmatpush.xpose.msk.msra.mxu0 %vm258_vm0, %v222_v9  ;;  %v1853_v37 = vld [vmem:[%s1696_s25 + $0x118] sm:$0xff]  ;;  %v1866_v40 = vld [vmem:[%s1696_s25 + $0x110] sm:$0xff]  ;;  %v1879_v43 = vld [vmem:[%s1696_s25 + $0x108] sm:$0xff] }
  0x26   : > { %1401 = vmatpush.xpose.msk.msra.mxu2 %vm258_vm0, %v1736_v10  ;;  %v1859_v38 = vld [vmem:[%s1696_s25 + $0x98] sm:$0xff]  ;;  %v1872_v41 = vld [vmem:[%s1696_s25 + $0x90] sm:$0xff]  ;;  %v1885_v44 = vld [vmem:[%s1696_s25 + $0x88] sm:$0xff] }
  0x27   : > { %1337 = vmatpush.xpose.msk.msra.mxu1 %vm258_vm0, %v1742_v11  ;;  %v210_v45 = vld [vmem:[%s1696_s25] sm:$0xff]  ;;  %v1927_v50 = vld [vmem:[%s1902_s28 + $0x128] sm:$0xff]  ;;  %v1940_v52 = vld [vmem:[%s1902_s28 + $0x130] sm:$0xff] }
  0x28   : > { %v1892_v46 = vld [vmem:[%s1696_s25 + $0x100] sm:$0xff]  ;;  %v163_v51 = vld [vmem:[%s1902_s28 + $0x8] sm:$0xff]  ;;  %v164_v53 = vld [vmem:[%s1902_s28 + $0x10] sm:$0xff] }
  0x29   : > { %1469 = vmatpush.xpose.msk.msra.mxu3 %vm258_vm0, %v221_v12  ;;  %1274 = vmatpush.xpose.msk.msra.mxu0 %vm258_vm0, %v221_v12  ;;  %v1905_v47 = vld [vmem:[%s1696_s25 + $0x80] sm:$0xff]  ;;  %v1953_v54 = vld [vmem:[%s1902_s28 + $0x138] sm:$0xff]  ;;  %v1979_v58 = vld [vmem:[%s1902_s28 + $0x148] sm:$0xff] }
  0x2a   : > { %1402 = vmatpush.xpose.msk.msra.mxu2 %vm258_vm0, %v1749_v13  ;;  %v1911_v48 = vld [vmem:[%s1902_s28 + $0x120] sm:$0xff]  ;;  %v165_v55 = vld [vmem:[%s1902_s28 + $0x18] sm:$0xff]  ;;  %v167_v59 = vld [vmem:[%s1902_s28 + $0x28] sm:$0xff] }
  0x2b   : > { %1338 = vmatpush.xpose.msk.msra.mxu1 %vm258_vm0, %v1755_v14  ;;  %v162_v49 = vld [vmem:[%s1902_s28] sm:$0xff]  ;;  %v1992_v60 = vld [vmem:[%s1902_s28 + $0x150] sm:$0xff]  ;;  %v2005_v62 = vld [vmem:[%s1902_s28 + $0x158] sm:$0xff] }
  0x2c   : > { %v1966_v56 = vld [vmem:[%s1902_s28 + $0x140] sm:$0xff]  ;;  %v168_v61 = vld [vmem:[%s1902_s28 + $0x30] sm:$0xff]  ;;  %v169_v63 = vld [vmem:[%s1902_s28 + $0x38] sm:$0xff] }
  0x2d   : > { %1470 = vmatpush.xpose.msk.msra.mxu3 %vm258_vm0, %v220_v15  ;;  %1275 = vmatpush.xpose.msk.msra.mxu0 %vm258_vm0, %v220_v15  ;;  %v166_v57 = vld [vmem:[%s1902_s28 + $0x20] sm:$0xff]  ;;  %v171_v3 = vld [vmem:[%s1902_s28 + $0x48] sm:$0xff]  ;;  %v2059_v6 = vld [vmem:[%s1902_s28 + $0x178] sm:$0xff] }
  0x2e   : > { %1403 = vmatpush.xpose.msk.msra.mxu2 %vm258_vm0, %v1762_v16  ;;  %v2020_v0 = vld [vmem:[%s1902_s28 + $0x160] sm:$0xff]  ;;  %v175_v9 = vld [vmem:[%s1902_s28 + $0x68] sm:$0xff] }
  0x2f   : > { %1339 = vmatpush.xpose.msk.msra.mxu1 %vm258_vm0, %v1768_v17  ;;  %v178_v12 = vld [vmem:[%s1902_s28 + $0x80] sm:$0xff] }
  0x31   : > { %1471 = vmatpush.xpose.msk.msra.mxu3 %vm258_vm0, %v219_v18  ;;  %1276 = vmatpush.xpose.msk.msra.mxu0 %vm258_vm0, %v219_v18 }
  0x32   : > { %1404 = vmatpush.xpose.msk.msra.mxu2 %vm258_vm0, %v1775_v19 }
  0x33   : > { %1340 = vmatpush.xpose.msk.msra.mxu1 %vm258_vm0, %v1781_v20 }
  0x35   : > { %1472 = vmatpush.xpose.msk.msra.mxu3 %vm258_vm0, %v218_v21  ;;  %1277 = vmatpush.xpose.msk.msra.mxu0 %vm258_vm0, %v218_v21 }
  0x36   : > { %1405 = vmatpush.xpose.msk.msra.mxu2 %vm258_vm0, %v1788_v22 }
  0x37   : > { %1341 = vmatpush.xpose.msk.msra.mxu1 %vm258_vm0, %v1794_v23 }
  0x39   : > { %1473 = vmatpush.xpose.msk.msra.mxu3 %vm258_vm0, %v217_v24  ;;  %1278 = vmatpush.xpose.msk.msra.mxu0 %vm258_vm0, %v217_v24 }
  0x3a   : > { %1406 = vmatpush.xpose.msk.msra.mxu2 %vm258_vm0, %v1801_v25 }
  0x3b   : > { %1342 = vmatpush.xpose.msk.msra.mxu1 %vm258_vm0, %v1807_v26 }
  0x3d   : > { %1474 = vmatpush.xpose.msk.msra.mxu3 %vm258_vm0, %v216_v27  ;;  %1279 = vmatpush.xpose.msk.msra.mxu0 %vm258_vm0, %v216_v27  ;;  %v181_v27 = vld [vmem:[%s1902_s28 + $0x98] sm:$0xff] }
  0x3e   : > { %1407 = vmatpush.xpose.msk.msra.mxu2 %vm258_vm0, %v1814_v28 }
  0x3f   : > { %1343 = vmatpush.xpose.msk.msra.mxu1 %vm258_vm0, %v1820_v29 }
  0x41   : > { %1475 = vmatpush.xpose.msk.msra.mxu3 %vm258_vm0, %v215_v30  ;;  %1280 = vmatpush.xpose.msk.msra.mxu0 %vm258_vm0, %v215_v30 }
  0x42   : > { %1408 = vmatpush.xpose.msk.msra.mxu2 %vm258_vm0, %v1827_v31 }
  0x43   : > { %1344 = vmatpush.xpose.msk.msra.mxu1 %vm258_vm0, %v1833_v32 }
  0x45   : > { %1476 = vmatpush.xpose.msk.msra.mxu3 %vm258_vm0, %v214_v33  ;;  %1281 = vmatpush.xpose.msk.msra.mxu0 %vm258_vm0, %v214_v33 }
  0x46   : > { %1409 = vmatpush.xpose.msk.msra.mxu2 %vm258_vm0, %v1840_v34 }
  0x47   : > { %1345 = vmatpush.xpose.msk.msra.mxu1 %vm258_vm0, %v1846_v35 }
  0x49   : > { %1477 = vmatpush.xpose.msk.msra.mxu3 %vm258_vm0, %v213_v36  ;;  %1282 = vmatpush.xpose.msk.msra.mxu0 %vm258_vm0, %v213_v36 }
  0x4a   : > { %1410 = vmatpush.xpose.msk.msra.mxu2 %vm258_vm0, %v1853_v37 }
  0x4b   : > { %1346 = vmatpush.xpose.msk.msra.mxu1 %vm258_vm0, %v1859_v38 }
  0x4d   : > { %1478 = vmatpush.xpose.msk.msra.mxu3 %vm258_vm0, %v212_v39  ;;  %1283 = vmatpush.xpose.msk.msra.mxu0 %vm258_vm0, %v212_v39 }
  0x4e   : > { %1411 = vmatpush.xpose.msk.msra.mxu2 %vm258_vm0, %v1866_v40 }
  0x4f   : > { %1347 = vmatpush.xpose.msk.msra.mxu1 %vm258_vm0, %v1872_v41 }
  0x51   : > { %1479 = vmatpush.xpose.msk.msra.mxu3 %vm258_vm0, %v211_v42  ;;  %1284 = vmatpush.xpose.msk.msra.mxu0 %vm258_vm0, %v211_v42  ;;  %v184_v42 = vld [vmem:[%s1902_s28 + $0xb0] sm:$0xff] }
  0x52   : > { %1412 = vmatpush.xpose.msk.msra.mxu2 %vm258_vm0, %v1879_v43 }
  0x53   : > { %1348 = vmatpush.xpose.msk.msra.mxu1 %vm258_vm0, %v1885_v44 }
  0x55   : > { %1480 = vmatpush.xpose.msk.msra.mxu3 %vm258_vm0, %v210_v45  ;;  %1285 = vmatpush.xpose.msk.msra.mxu0 %vm258_vm0, %v210_v45 }
  0x56   : > { %1413 = vmatpush.xpose.msk.msra.mxu2 %vm258_vm0, %v1892_v46 }
  0x57   : > { %1349 = vmatpush.xpose.msk.msra.mxu1 %vm258_vm0, %v1905_v47 }
  0x58   : > { %1322 = vmatmul.msk.f32.vlgmr.msra.gmra.mxu3 %vm258_vm0, %v1911_v48  ;;  %1286 = vmatmul.msk.f32.vlgmr.msra.gmra.mxu0 %vm258_vm0, %v162_v49 }
  0x59   : > { %1481 = vmatpush.xpose.msk.msrb.mxu3 %vm258_vm0, %v1706_v2  ;;  %1414 = vmatmul.msk.f32.vlgmr.msra.gmra.mxu2 %vm258_vm0, %v162_v49  ;;  %v170_v2 = vld [vmem:[%s1902_s28 + $0x40] sm:$0xff] }
  0x5a   : > { %1350 = vmatmul.msk.f32.vlgmr.msra.gmra.mxu1 %vm258_vm0, %v162_v49 }
  0x5d   : > { %1482 = vmatpush.xpose.msk.msrb.mxu3 %vm258_vm0, %v1716_v5  ;;  %v172_v5 = vld [vmem:[%s1902_s28 + $0x50] sm:$0xff] }
  0x60   : > { %1323 = vmatmul.msk.f32.gmra.mxu3 %vm258_vm0, %v1927_v50  ;;  %1287 = vmatmul.msk.f32.gmra.mxu0 %vm258_vm0, %v163_v51 }
  0x61   : > { %1483 = vmatpush.xpose.msk.msrb.mxu3 %vm258_vm0, %v1729_v8  ;;  %1415 = vmatmul.msk.f32.gmra.mxu2 %vm258_vm0, %v163_v51  ;;  %v174_v8 = vld [vmem:[%s1902_s28 + $0x60] sm:$0xff] }
  0x62   : > { %1351 = vmatmul.msk.f32.gmra.mxu1 %vm258_vm0, %v163_v51 }
  0x65   : > { %1484 = vmatpush.xpose.msk.msrb.mxu3 %vm258_vm0, %v1742_v11  ;;  %v177_v11 = vld [vmem:[%s1902_s28 + $0x78] sm:$0xff] }
  0x68   : > { %1324 = vmatmul.msk.f32.gmra.mxu3 %vm258_vm0, %v1940_v52  ;;  %1288 = vmatmul.msk.f32.gmra.mxu0 %vm258_vm0, %v164_v53 }
  0x69   : > { %1485 = vmatpush.xpose.msk.msrb.mxu3 %vm258_vm0, %v1755_v14  ;;  %1416 = vmatmul.msk.f32.gmra.mxu2 %vm258_vm0, %v164_v53 }
  0x6a   : > { %1352 = vmatmul.msk.f32.gmra.mxu1 %vm258_vm0, %v164_v53 }
  0x6d   : > { %1486 = vmatpush.xpose.msk.msrb.mxu3 %vm258_vm0, %v1768_v17  ;;  %v179_v17 = vld [vmem:[%s1902_s28 + $0x88] sm:$0xff] }
  0x70   : > { %1325 = vmatmul.msk.f32.gmra.mxu3 %vm258_vm0, %v1953_v54  ;;  %1289 = vmatmul.msk.f32.gmra.mxu0 %vm258_vm0, %v165_v55 }
  0x71   : > { %1487 = vmatpush.xpose.msk.msrb.mxu3 %vm258_vm0, %v1781_v20  ;;  %1417 = vmatmul.msk.f32.gmra.mxu2 %vm258_vm0, %v165_v55 }
  0x72   : > { %1353 = vmatmul.msk.f32.gmra.mxu1 %vm258_vm0, %v165_v55 }
  0x75   : > { %1488 = vmatpush.xpose.msk.msrb.mxu3 %vm258_vm0, %v1794_v23 }
  0x78   : > { %1326 = vmatmul.msk.f32.gmra.mxu3 %vm258_vm0, %v1966_v56  ;;  %1290 = vmatmul.msk.f32.gmra.mxu0 %vm258_vm0, %v166_v57 }
  0x79   : > { %1489 = vmatpush.xpose.msk.msrb.mxu3 %vm258_vm0, %v1807_v26  ;;  %1418 = vmatmul.msk.f32.gmra.mxu2 %vm258_vm0, %v166_v57 }
  0x7a   : > { %1354 = vmatmul.msk.f32.gmra.mxu1 %vm258_vm0, %v166_v57  ;;  %v186_v57 = vld [vmem:[%s1902_s28 + $0xc0] sm:$0xff] }
  0x7d   : > { %1490 = vmatpush.xpose.msk.msrb.mxu3 %vm258_vm0, %v1820_v29 }
  0x80   : > { %1327 = vmatmul.msk.f32.gmra.mxu3 %vm258_vm0, %v1979_v58  ;;  %1291 = vmatmul.msk.f32.gmra.mxu0 %vm258_vm0, %v167_v59 }
  0x81   : > { %1491 = vmatpush.xpose.msk.msrb.mxu3 %vm258_vm0, %v1833_v32  ;;  %1419 = vmatmul.msk.f32.gmra.mxu2 %vm258_vm0, %v167_v59  ;;  %v182_v32 = vld [vmem:[%s1902_s28 + $0xa0] sm:$0xff] }
  0x82   : > { %1355 = vmatmul.msk.f32.gmra.mxu1 %vm258_vm0, %v167_v59 }
  0x85   : > { %1492 = vmatpush.xpose.msk.msrb.mxu3 %vm258_vm0, %v1846_v35 }
  0x88   : > { %1328 = vmatmul.msk.f32.gmra.mxu3 %vm258_vm0, %v1992_v60  ;;  %1292 = vmatmul.msk.f32.gmra.mxu0 %vm258_vm0, %v168_v61 }
  0x89   : > { %1493 = vmatpush.xpose.msk.msrb.mxu3 %vm258_vm0, %v1859_v38  ;;  %1420 = vmatmul.msk.f32.gmra.mxu2 %vm258_vm0, %v168_v61 }
  0x8a   : > { %1356 = vmatmul.msk.f32.gmra.mxu1 %vm258_vm0, %v168_v61 }
  0x8d   : > { %1494 = vmatpush.xpose.msk.msrb.mxu3 %vm258_vm0, %v1872_v41 }
  0x90   : > { %1329 = vmatmul.msk.f32.gmra.mxu3 %vm258_vm0, %v2005_v62  ;;  %1293 = vmatmul.msk.f32.gmra.mxu0 %vm258_vm0, %v169_v63 }
  0x91   : > { %1495 = vmatpush.xpose.msk.msrb.mxu3 %vm258_vm0, %v1885_v44  ;;  %1421 = vmatmul.msk.f32.gmra.mxu2 %vm258_vm0, %v169_v63 }
  0x92   : > { %1357 = vmatmul.msk.f32.gmra.mxu1 %vm258_vm0, %v169_v63 }
  0x95   : > { %1496 = vmatpush.xpose.msk.msrb.mxu3 %vm258_vm0, %v1905_v47  ;;  %v185_v47 = vld [vmem:[%s1902_s28 + $0xb8] sm:$0xff] }
  0x98   : > { %1330 = vmatmul.msk.f32.gmra.mxu3 %vm258_vm0, %v2020_v0  ;;  %1294 = vmatmul.msk.f32.gmra.mxu0 %vm258_vm0, %v170_v2 }
  0x99   : > { %1497 = vmatpush.xpose.msk.msra.mxu3 %vm258_vm0, %v1700_v1  ;;  %1422 = vmatmul.msk.f32.gmra.mxu2 %vm258_vm0, %v170_v2  ;;  %v2033_v1 = vld [vmem:[%s1902_s28 + $0x168] sm:$0xff] }
  0x9a   : > { %1358 = vmatmul.msk.f32.gmra.mxu1 %vm258_vm0, %v170_v2 }
  0x9d   : > { %1498 = vmatpush.xpose.msk.msra.mxu3 %vm258_vm0, %v1710_v4  ;;  %v2046_v4 = vld [vmem:[%s1902_s28 + $0x170] sm:$0xff] }
  0xa0   : > { %1331 = vmatmul.msk.f32.gmra.mxu3 %vm258_vm0, %v2033_v1  ;;  %1295 = vmatmul.msk.f32.gmra.mxu0 %vm258_vm0, %v171_v3 }
  0xa1   : > { %1499 = vmatpush.xpose.msk.msra.mxu3 %vm258_vm0, %v1723_v7  ;;  %1423 = vmatmul.msk.f32.gmra.mxu2 %vm258_vm0, %v171_v3  ;;  %v173_v7 = vld [vmem:[%s1902_s28 + $0x58] sm:$0xff] }
  0xa2   : > { %1359 = vmatmul.msk.f32.gmra.mxu1 %vm258_vm0, %v171_v3  ;;  %v187_v3 = vld [vmem:[%s1902_s28 + $0xc8] sm:$0xff] }
  0xa5   : > { %1500 = vmatpush.xpose.msk.msra.mxu3 %vm258_vm0, %v1736_v10  ;;  %v176_v10 = vld [vmem:[%s1902_s28 + $0x70] sm:$0xff] }
  0xa8   : > { %1332 = vmatmul.msk.f32.gmra.mxu3 %vm258_vm0, %v2046_v4  ;;  %1296 = vmatmul.msk.f32.gmra.mxu0 %vm258_vm0, %v172_v5 }
  0xa9   : > { %1501 = vmatpush.xpose.msk.msra.mxu3 %vm258_vm0, %v1749_v13  ;;  %1424 = vmatmul.msk.f32.gmra.mxu2 %vm258_vm0, %v172_v5 }
  0xaa   : > { %1360 = vmatmul.msk.f32.gmra.mxu1 %vm258_vm0, %v172_v5 }
  0xad   : > { %1502 = vmatpush.xpose.msk.msra.mxu3 %vm258_vm0, %v1762_v16 }
  0xb0   : > { %1333 = vmatmul.msk.f32.gmra.mxu3 %vm258_vm0, %v2059_v6  ;;  %1297 = vmatmul.msk.f32.gmra.mxu0 %vm258_vm0, %v173_v7 }
  0xb1   : > { %1503 = vmatpush.xpose.msk.msra.mxu3 %vm258_vm0, %v1775_v19  ;;  %1425 = vmatmul.msk.f32.gmra.mxu2 %vm258_vm0, %v173_v7 }
  0xb2   : > { %1361 = vmatmul.msk.f32.gmra.mxu1 %vm258_vm0, %v173_v7 }
  0xb5   : > { %1504 = vmatpush.xpose.msk.msra.mxu3 %vm258_vm0, %v1788_v22  ;;  %v180_v22 = vld [vmem:[%s1902_s28 + $0x90] sm:$0xff] }
  0xb8   : > { %1386 = vmatmul.msk.f32.vlgmr.msrb.gmra.mxu3 %vm258_vm0, %v1911_v48  ;;  %1298 = vmatmul.msk.f32.gmra.mxu0 %vm258_vm0, %v174_v8 }
  0xb9   : > { %1505 = vmatpush.xpose.msk.msra.mxu3 %vm258_vm0, %v1801_v25  ;;  %1426 = vmatmul.msk.f32.gmra.mxu2 %vm258_vm0, %v174_v8 }
  0xba   : > { %1362 = vmatmul.msk.f32.gmra.mxu1 %vm258_vm0, %v174_v8 }
  0xbd   : > { %1506 = vmatpush.xpose.msk.msra.mxu3 %vm258_vm0, %v1814_v28 }
  0xc0   : > { %1387 = vmatmul.msk.f32.gmra.mxu3 %vm258_vm0, %v1927_v50  ;;  %1299 = vmatmul.msk.f32.gmra.mxu0 %vm258_vm0, %v175_v9 }
  0xc1   : > { %1507 = vmatpush.xpose.msk.msra.mxu3 %vm258_vm0, %v1827_v31  ;;  %1427 = vmatmul.msk.f32.gmra.mxu2 %vm258_vm0, %v175_v9 }
  0xc2   : > { %1363 = vmatmul.msk.f32.gmra.mxu1 %vm258_vm0, %v175_v9  ;;  %v188_v9 = vld [vmem:[%s1902_s28 + $0xd0] sm:$0xff] }
  0xc5   : > { %1508 = vmatpush.xpose.msk.msra.mxu3 %vm258_vm0, %v1840_v34 }
  0xc8   : > { %1388 = vmatmul.msk.f32.gmra.mxu3 %vm258_vm0, %v1940_v52  ;;  %1300 = vmatmul.msk.f32.gmra.mxu0 %vm258_vm0, %v176_v10 }
  0xc9   : > { %1509 = vmatpush.xpose.msk.msra.mxu3 %vm258_vm0, %v1853_v37  ;;  %1428 = vmatmul.msk.f32.gmra.mxu2 %vm258_vm0, %v176_v10  ;;  %v183_v37 = vld [vmem:[%s1902_s28 + $0xa8] sm:$0xff] }
  0xca   : > { %1364 = vmatmul.msk.f32.gmra.mxu1 %vm258_vm0, %v176_v10 }
  0xcd   : > { %1510 = vmatpush.xpose.msk.msra.mxu3 %vm258_vm0, %v1866_v40 }
  0xd0   : > { %1389 = vmatmul.msk.f32.gmra.mxu3 %vm258_vm0, %v1953_v54  ;;  %1301 = vmatmul.msk.f32.gmra.mxu0 %vm258_vm0, %v177_v11 }
  0xd1   : > { %1511 = vmatpush.xpose.msk.msra.mxu3 %vm258_vm0, %v1879_v43  ;;  %1429 = vmatmul.msk.f32.gmra.mxu2 %vm258_vm0, %v177_v11 }
  0xd2   : > { %1365 = vmatmul.msk.f32.gmra.mxu1 %vm258_vm0, %v177_v11 }
  0xd5   : > { %1512 = vmatpush.xpose.msk.msra.mxu3 %vm258_vm0, %v1892_v46  ;;  %v564_v13 = vpop.f32.mrf.mxu0 }
  0xd6   : > { %1030 = vst [vmem:[%s2113_s3] sm:$0xff] %v564_v13  ;;  %v189_v13 = vld [vmem:[%s1902_s28 + $0xd8] sm:$0xff] }
  0xd7   : > { %v725_v14 = vpop.f32.mrf.mxu1 }
  0xd8   : > { %1390 = vmatmul.msk.f32.gmra.mxu3 %vm258_vm0, %v1966_v56  ;;  %1031 = vst [vmem:[%s2113_s3 + $0x8] sm:$0xff] %v725_v14  ;;  %1302 = vmatmul.msk.f32.gmra.mxu0 %vm258_vm0, %v178_v12 }
  0xd9   : > { %1430 = vmatmul.msk.f32.gmra.mxu2 %vm258_vm0, %v178_v12 }
  0xda   : > { %1366 = vmatmul.msk.f32.gmra.mxu1 %vm258_vm0, %v178_v12 }
  0xdb   : > { %v672_v15 = vpop.f32.mrf.mxu3 }
  0xdc   : > { %v886_v16 = vpop.f32.mrf.mxu2  ;;  %1138 = vst [vmem:[%s2113_s3 + $0x360] sm:$0xff] %v672_v15 }
  0xdd   : > { %1032 = vst [vmem:[%s2113_s3 + $0x10] sm:$0xff] %v886_v16  ;;  %v567_v18 = vpop.f32.mrf.mxu0 }
  0xde   : > { %1033 = vst [vmem:[%s2113_s3 + $0x18] sm:$0xff] %v567_v18 }
  0xdf   : > { %v728_v19 = vpop.f32.mrf.mxu1 }
  0xe0   : > { %1391 = vmatmul.msk.f32.gmra.mxu3 %vm258_vm0, %v1979_v58  ;;  %1034 = vst [vmem:[%s2113_s3 + $0x20] sm:$0xff] %v728_v19  ;;  %1303 = vmatmul.msk.f32.gmra.mxu0 %vm258_vm0, %v179_v17 }
  0xe1   : > { %1431 = vmatmul.msk.f32.gmra.mxu2 %vm258_vm0, %v179_v17 }
  0xe2   : > { %1367 = vmatmul.msk.f32.gmra.mxu1 %vm258_vm0, %v179_v17  ;;  %v190_v17 = vld [vmem:[%s1902_s28 + $0xe0] sm:$0xff] }
  0xe3   : > { %v675_v20 = vpop.f32.mrf.mxu3 }
  0xe4   : > { %v889_v21 = vpop.f32.mrf.mxu2  ;;  %1141 = vst [vmem:[%s2113_s3 + $0x378] sm:$0xff] %v675_v20 }
  0xe5   : > { %1035 = vst [vmem:[%s2113_s3 + $0x28] sm:$0xff] %v889_v21  ;;  %v570_v23 = vpop.f32.mrf.mxu0  ;;  %v191_v21 = vld [vmem:[%s1902_s28 + $0xe8] sm:$0xff] }
  0xe6   : > { %1036 = vst [vmem:[%s2113_s3 + $0x30] sm:$0xff] %v570_v23 }
  0xe7   : > { %v731_v24 = vpop.f32.mrf.mxu1 }
  0xe8   : > { %1392 = vmatmul.msk.f32.gmra.mxu3 %vm258_vm0, %v1992_v60  ;;  %1037 = vst [vmem:[%s2113_s3 + $0x38] sm:$0xff] %v731_v24  ;;  %1304 = vmatmul.msk.f32.gmra.mxu0 %vm258_vm0, %v180_v22 }
  0xe9   : > { %1432 = vmatmul.msk.f32.gmra.mxu2 %vm258_vm0, %v180_v22 }
  0xea   : > { %1368 = vmatmul.msk.f32.gmra.mxu1 %vm258_vm0, %v180_v22 }
  0xeb   : > { %v678_v25 = vpop.f32.mrf.mxu3 }
  0xec   : > { %v892_v26 = vpop.f32.mrf.mxu2  ;;  %1144 = vst [vmem:[%s2113_s3 + $0x390] sm:$0xff] %v678_v25  ;;  %v192_v25 = vld [vmem:[%s1902_s28 + $0xf0] sm:$0xff] }
  0xed   : > { %1038 = vst [vmem:[%s2113_s3 + $0x40] sm:$0xff] %v892_v26  ;;  %v573_v28 = vpop.f32.mrf.mxu0 }
  0xee   : > { %1039 = vst [vmem:[%s2113_s3 + $0x48] sm:$0xff] %v573_v28 }
  0xef   : > { %v734_v29 = vpop.f32.mrf.mxu1 }
  0xf0   : > { %1393 = vmatmul.msk.f32.gmra.mxu3 %vm258_vm0, %v2005_v62  ;;  %1040 = vst [vmem:[%s2113_s3 + $0x50] sm:$0xff] %v734_v29  ;;  %1305 = vmatmul.msk.f32.gmra.mxu0 %vm258_vm0, %v181_v27  ;;  %v193_v29 = vld [vmem:[%s1902_s28 + $0xf8] sm:$0xff] }
  0xf1   : > { %1433 = vmatmul.msk.f32.gmra.mxu2 %vm258_vm0, %v181_v27 }
  0xf2   : > { %1369 = vmatmul.msk.f32.gmra.mxu1 %vm258_vm0, %v181_v27 }
  0xf3   : > { %v681_v30 = vpop.f32.mrf.mxu3 }
  0xf4   : > { %v895_v31 = vpop.f32.mrf.mxu2  ;;  %1147 = vst [vmem:[%s2113_s3 + $0x3a8] sm:$0xff] %v681_v30 }
  0xf5   : > { %1041 = vst [vmem:[%s2113_s3 + $0x58] sm:$0xff] %v895_v31  ;;  %v576_v33 = vpop.f32.mrf.mxu0 }
  0xf6   : > { %1042 = vst [vmem:[%s2113_s3 + $0x60] sm:$0xff] %v576_v33  ;;  %v194_v33 = vld [vmem:[%s1902_s28 + $0x100] sm:$0xff] }
  0xf7   : > { %v737_v34 = vpop.f32.mrf.mxu1 }
  0xf8   : > { %1394 = vmatmul.msk.f32.gmra.mxu3 %vm258_vm0, %v2020_v0  ;;  %1043 = vst [vmem:[%s2113_s3 + $0x68] sm:$0xff] %v737_v34  ;;  %1306 = vmatmul.msk.f32.gmra.mxu0 %vm258_vm0, %v182_v32 }
  0xf9   : > { %1434 = vmatmul.msk.f32.gmra.mxu2 %vm258_vm0, %v182_v32 }
  0xfa   : > { %1370 = vmatmul.msk.f32.gmra.mxu1 %vm258_vm0, %v182_v32 }
  0xfb   : > { %v684_v35 = vpop.f32.mrf.mxu3 }
  0xfc   : > { %v898_v36 = vpop.f32.mrf.mxu2  ;;  %1150 = vst [vmem:[%s2113_s3 + $0x3c0] sm:$0xff] %v684_v35 }
  0xfd   : > { %1044 = vst [vmem:[%s2113_s3 + $0x70] sm:$0xff] %v898_v36  ;;  %v579_v38 = vpop.f32.mrf.mxu0 }
  0xfe   : > { %1045 = vst [vmem:[%s2113_s3 + $0x78] sm:$0xff] %v579_v38 }
  0xff   : > { %v740_v39 = vpop.f32.mrf.mxu1 }
 0x100   : > { %1395 = vmatmul.msk.f32.gmra.mxu3 %vm258_vm0, %v2033_v1  ;;  %1046 = vst [vmem:[%s2113_s3 + $0x80] sm:$0xff] %v740_v39  ;;  %1307 = vmatmul.msk.f32.gmra.mxu0 %vm258_vm0, %v183_v37 }
 0x101   : > { %1435 = vmatmul.msk.f32.gmra.mxu2 %vm258_vm0, %v183_v37 }
 0x102   : > { %1371 = vmatmul.msk.f32.gmra.mxu1 %vm258_vm0, %v183_v37  ;;  %v195_v37 = vld [vmem:[%s1902_s28 + $0x108] sm:$0xff] }
 0x103   : > { %v687_v40 = vpop.f32.mrf.mxu3 }
 0x104   : > { %v901_v41 = vpop.f32.mrf.mxu2  ;;  %1153 = vst [vmem:[%s2113_s3 + $0x3d8] sm:$0xff] %v687_v40 }
 0x105   : > { %1047 = vst [vmem:[%s2113_s3 + $0x88] sm:$0xff] %v901_v41  ;;  %v582_v43 = vpop.f32.mrf.mxu0  ;;  %v196_v41 = vld [vmem:[%s1902_s28 + $0x110] sm:$0xff] }
 0x106   : > { %1048 = vst [vmem:[%s2113_s3 + $0x90] sm:$0xff] %v582_v43 }
 0x107   : > { %v743_v44 = vpop.f32.mrf.mxu1 }
 0x108   : > { %1396 = vmatmul.msk.f32.gmra.mxu3 %vm258_vm0, %v2046_v4  ;;  %1049 = vst [vmem:[%s2113_s3 + $0x98] sm:$0xff] %v743_v44  ;;  %1308 = vmatmul.msk.f32.gmra.mxu0 %vm258_vm0, %v184_v42 }
 0x109   : > { %1436 = vmatmul.msk.f32.gmra.mxu2 %vm258_vm0, %v184_v42 }
 0x10a   : > { %1372 = vmatmul.msk.f32.gmra.mxu1 %vm258_vm0, %v184_v42 }
 0x10b   : > { %v690_v45 = vpop.f32.mrf.mxu3 }
 0x10c   : > { %v904_v46 = vpop.f32.mrf.mxu2  ;;  %1156 = vst [vmem:[%s2113_s3 + $0x3f0] sm:$0xff] %v690_v45  ;;  %v197_v45 = vld [vmem:[%s1902_s28 + $0x118] sm:$0xff] }
 0x10d   : > { %1050 = vst [vmem:[%s2113_s3 + $0xa0] sm:$0xff] %v904_v46  ;;  %v585_v49 = vpop.f32.mrf.mxu0 }
 0x10e   : > { %1051 = vst [vmem:[%s2113_s3 + $0xa8] sm:$0xff] %v585_v49 }
 0x10f   : > { %v746_v51 = vpop.f32.mrf.mxu1 }
 0x110   : > { %1397 = vmatmul.msk.f32.gmra.mxu3 %vm258_vm0, %v2059_v6  ;;  %1052 = vst [vmem:[%s2113_s3 + $0xb0] sm:$0xff] %v746_v51  ;;  %1309 = vmatmul.msk.f32.gmra.mxu0 %vm258_vm0, %v185_v47 }
 0x111   : > { %1437 = vmatmul.msk.f32.gmra.mxu2 %vm258_vm0, %v185_v47 }
 0x112   : > { %1373 = vmatmul.msk.f32.gmra.mxu1 %vm258_vm0, %v185_v47 }
 0x113   : > { %v693_v53 = vpop.f32.mrf.mxu3 }
 0x114   : > { %v907_v55 = vpop.f32.mrf.mxu2  ;;  %1159 = vst [vmem:[%s2113_s3 + $0x408] sm:$0xff] %v693_v53 }
 0x115   : > { %1053 = vst [vmem:[%s2113_s3 + $0xb8] sm:$0xff] %v907_v55  ;;  %v588_v59 = vpop.f32.mrf.mxu0 }
 0x116   : > { %1054 = vst [vmem:[%s2113_s3 + $0xc0] sm:$0xff] %v588_v59 }
 0x117   : > { %v749_v61 = vpop.f32.mrf.mxu1 }
 0x118   : > { %1450 = vmatmul.msk.f32.vlgmr.msra.gmra.mxu3 %vm258_vm0, %v1911_v48  ;;  %1055 = vst [vmem:[%s2113_s3 + $0xc8] sm:$0xff] %v749_v61  ;;  %1310 = vmatmul.msk.f32.gmra.mxu0 %vm258_vm0, %v186_v57 }
 0x119   : > { %1438 = vmatmul.msk.f32.gmra.mxu2 %vm258_vm0, %v186_v57 }
 0x11a   : > { %1374 = vmatmul.msk.f32.gmra.mxu1 %vm258_vm0, %v186_v57 }
 0x11b   : > { %v696_v63 = vpop.f32.mrf.mxu3 }
 0x11c   : > { %v910_v2 = vpop.f32.mrf.mxu2  ;;  %1162 = vst [vmem:[%s2113_s3 + $0x420] sm:$0xff] %v696_v63 }
 0x11d   : > { %1056 = vst [vmem:[%s2113_s3 + $0xd0] sm:$0xff] %v910_v2  ;;  %v591_v5 = vpop.f32.mrf.mxu0 }
 0x11e   : > { %1057 = vst [vmem:[%s2113_s3 + $0xd8] sm:$0xff] %v591_v5 }
 0x11f   : > { %v752_v7 = vpop.f32.mrf.mxu1 }
 0x120   : > { %1451 = vmatmul.msk.f32.gmra.mxu3 %vm258_vm0, %v1927_v50  ;;  %1058 = vst [vmem:[%s2113_s3 + $0xe0] sm:$0xff] %v752_v7  ;;  %1311 = vmatmul.msk.f32.gmra.mxu0 %vm258_vm0, %v187_v3 }
 0x121   : > { %1439 = vmatmul.msk.f32.gmra.mxu2 %vm258_vm0, %v187_v3 }
 0x122   : > { %1375 = vmatmul.msk.f32.gmra.mxu1 %vm258_vm0, %v187_v3 }
 0x123   : > { %v699_v48 = vpop.f32.mrf.mxu3 }
 0x124   : > { %v913_v8 = vpop.f32.mrf.mxu2  ;;  %1165 = vst [vmem:[%s2113_s3 + $0x438] sm:$0xff] %v699_v48 }
 0x125   : > { %1059 = vst [vmem:[%s2113_s3 + $0xe8] sm:$0xff] %v913_v8  ;;  %v594_v10 = vpop.f32.mrf.mxu0 }
 0x126   : > { %1060 = vst [vmem:[%s2113_s3 + $0xf0] sm:$0xff] %v594_v10 }
 0x127   : > { %v755_v11 = vpop.f32.mrf.mxu1 }
 0x128   : > { %1452 = vmatmul.msk.f32.gmra.mxu3 %vm258_vm0, %v1940_v52  ;;  %1061 = vst [vmem:[%s2113_s3 + $0xf8] sm:$0xff] %v755_v11  ;;  %1312 = vmatmul.msk.f32.gmra.mxu0 %vm258_vm0, %v188_v9 }
 0x129   : > { %1440 = vmatmul.msk.f32.gmra.mxu2 %vm258_vm0, %v188_v9 }
 0x12a   : > { %1376 = vmatmul.msk.f32.gmra.mxu1 %vm258_vm0, %v188_v9 }
 0x12b   : > { %v702_v50 = vpop.f32.mrf.mxu3 }
 0x12c   : > { %v916_v12 = vpop.f32.mrf.mxu2  ;;  %1168 = vst [vmem:[%s2113_s3 + $0x450] sm:$0xff] %v702_v50 }
 0x12d   : > { %1062 = vst [vmem:[%s2113_s3 + $0x100] sm:$0xff] %v916_v12  ;;  %v597_v14 = vpop.f32.mrf.mxu0 }
 0x12e   : > { %1063 = vst [vmem:[%s2113_s3 + $0x108] sm:$0xff] %v597_v14 }
 0x12f   : > { %v758_v15 = vpop.f32.mrf.mxu1 }
 0x130   : > { %1453 = vmatmul.msk.f32.gmra.mxu3 %vm258_vm0, %v1953_v54  ;;  %1064 = vst [vmem:[%s2113_s3 + $0x110] sm:$0xff] %v758_v15  ;;  %1313 = vmatmul.msk.f32.gmra.mxu0 %vm258_vm0, %v189_v13 }
 0x131   : > { %1441 = vmatmul.msk.f32.gmra.mxu2 %vm258_vm0, %v189_v13 }
 0x132   : > { %1377 = vmatmul.msk.f32.gmra.mxu1 %vm258_vm0, %v189_v13 }
 0x133   : > { %v705_v52 = vpop.f32.mrf.mxu3 }
 0x134   : > { %v919_v16 = vpop.f32.mrf.mxu2  ;;  %1171 = vst [vmem:[%s2113_s3 + $0x468] sm:$0xff] %v705_v52 }
 0x135   : > { %1065 = vst [vmem:[%s2113_s3 + $0x118] sm:$0xff] %v919_v16  ;;  %v600_v18 = vpop.f32.mrf.mxu0 }
 0x136   : > { %1066 = vst [vmem:[%s2113_s3 + $0x120] sm:$0xff] %v600_v18 }
 0x137   : > { %v761_v19 = vpop.f32.mrf.mxu1 }
 0x138   : > { %1454 = vmatmul.msk.f32.gmra.mxu3 %vm258_vm0, %v1966_v56  ;;  %1067 = vst [vmem:[%s2113_s3 + $0x128] sm:$0xff] %v761_v19  ;;  %1314 = vmatmul.msk.f32.gmra.mxu0 %vm258_vm0, %v190_v17 }
 0x139   : > { %1442 = vmatmul.msk.f32.gmra.mxu2 %vm258_vm0, %v190_v17 }
 0x13a   : > { %1378 = vmatmul.msk.f32.gmra.mxu1 %vm258_vm0, %v190_v17 }
 0x13b   : > { %v833_v54 = vpop.f32.mrf.mxu3 }
 0x13c   : > { %v922_v20 = vpop.f32.mrf.mxu2  ;;  %1139 = vst [vmem:[%s2113_s3 + $0x368] sm:$0xff] %v833_v54 }
 0x13d   : > { %1068 = vst [vmem:[%s2113_s3 + $0x130] sm:$0xff] %v922_v20  ;;  %v603_v22 = vpop.f32.mrf.mxu0 }
 0x13e   : > { %1069 = vst [vmem:[%s2113_s3 + $0x138] sm:$0xff] %v603_v22 }
 0x13f   : > { %v764_v23 = vpop.f32.mrf.mxu1 }
 0x140   : > { %1455 = vmatmul.msk.f32.gmra.mxu3 %vm258_vm0, %v1979_v58  ;;  %1070 = vst [vmem:[%s2113_s3 + $0x140] sm:$0xff] %v764_v23  ;;  %1315 = vmatmul.msk.f32.gmra.mxu0 %vm258_vm0, %v191_v21 }
 0x141   : > { %1443 = vmatmul.msk.f32.gmra.mxu2 %vm258_vm0, %v191_v21 }
 0x142   : > { %1379 = vmatmul.msk.f32.gmra.mxu1 %vm258_vm0, %v191_v21 }
 0x143   : > { %v836_v56 = vpop.f32.mrf.mxu3 }
 0x144   : > { %v925_v24 = vpop.f32.mrf.mxu2  ;;  %1142 = vst [vmem:[%s2113_s3 + $0x380] sm:$0xff] %v836_v56 }
 0x145   : > { %1071 = vst [vmem:[%s2113_s3 + $0x148] sm:$0xff] %v925_v24  ;;  %v606_v26 = vpop.f32.mrf.mxu0 }
 0x146   : > { %1072 = vst [vmem:[%s2113_s3 + $0x150] sm:$0xff] %v606_v26 }
 0x147   : > { %v767_v27 = vpop.f32.mrf.mxu1 }
 0x148   : > { %1456 = vmatmul.msk.f32.gmra.mxu3 %vm258_vm0, %v1992_v60  ;;  %1073 = vst [vmem:[%s2113_s3 + $0x158] sm:$0xff] %v767_v27  ;;  %1316 = vmatmul.msk.f32.gmra.mxu0 %vm258_vm0, %v192_v25 }
 0x149   : > { %1444 = vmatmul.msk.f32.gmra.mxu2 %vm258_vm0, %v192_v25 }
 0x14a   : > { %1380 = vmatmul.msk.f32.gmra.mxu1 %vm258_vm0, %v192_v25 }
 0x14b   : > { %v839_v58 = vpop.f32.mrf.mxu3 }
 0x14c   : > { %v928_v28 = vpop.f32.mrf.mxu2  ;;  %1145 = vst [vmem:[%s2113_s3 + $0x398] sm:$0xff] %v839_v58 }
 0x14d   : > { %1074 = vst [vmem:[%s2113_s3 + $0x160] sm:$0xff] %v928_v28  ;;  %v609_v30 = vpop.f32.mrf.mxu0 }
 0x14e   : > { %1075 = vst [vmem:[%s2113_s3 + $0x168] sm:$0xff] %v609_v30 }
 0x14f   : > { %v770_v31 = vpop.f32.mrf.mxu1 }
 0x150   : > { %1457 = vmatmul.msk.f32.gmra.mxu3 %vm258_vm0, %v2005_v62  ;;  %1076 = vst [vmem:[%s2113_s3 + $0x170] sm:$0xff] %v770_v31  ;;  %1317 = vmatmul.msk.f32.gmra.mxu0 %vm258_vm0, %v193_v29 }
 0x151   : > { %1445 = vmatmul.msk.f32.gmra.mxu2 %vm258_vm0, %v193_v29 }
 0x152   : > { %1381 = vmatmul.msk.f32.gmra.mxu1 %vm258_vm0, %v193_v29 }
 0x153   : > { %v842_v60 = vpop.f32.mrf.mxu3 }
 0x154   : > { %v931_v32 = vpop.f32.mrf.mxu2  ;;  %1148 = vst [vmem:[%s2113_s3 + $0x3b0] sm:$0xff] %v842_v60 }
 0x155   : > { %1077 = vst [vmem:[%s2113_s3 + $0x178] sm:$0xff] %v931_v32  ;;  %v612_v34 = vpop.f32.mrf.mxu0 }
 0x156   : > { %1078 = vst [vmem:[%s2113_s3 + $0x180] sm:$0xff] %v612_v34 }
 0x157   : > { %v773_v35 = vpop.f32.mrf.mxu1 }
 0x158   : > { %1458 = vmatmul.msk.f32.gmra.mxu3 %vm258_vm0, %v2020_v0  ;;  %1079 = vst [vmem:[%s2113_s3 + $0x188] sm:$0xff] %v773_v35  ;;  %1318 = vmatmul.msk.f32.gmra.mxu0 %vm258_vm0, %v194_v33 }
 0x159   : > { %1446 = vmatmul.msk.f32.gmra.mxu2 %vm258_vm0, %v194_v33 }
 0x15a   : > { %1382 = vmatmul.msk.f32.gmra.mxu1 %vm258_vm0, %v194_v33 }
 0x15b   : > { %v845_v62 = vpop.f32.mrf.mxu3 }
 0x15c   : > { %v934_v36 = vpop.f32.mrf.mxu2  ;;  %1151 = vst [vmem:[%s2113_s3 + $0x3c8] sm:$0xff] %v845_v62 }
 0x15d   : > { %1080 = vst [vmem:[%s2113_s3 + $0x190] sm:$0xff] %v934_v36  ;;  %v615_v38 = vpop.f32.mrf.mxu0 }
 0x15e   : > { %1081 = vst [vmem:[%s2113_s3 + $0x198] sm:$0xff] %v615_v38 }
 0x15f   : > { %v776_v39 = vpop.f32.mrf.mxu1 }
 0x160   : > { %1459 = vmatmul.msk.f32.gmra.mxu3 %vm258_vm0, %v2033_v1  ;;  %1082 = vst [vmem:[%s2113_s3 + $0x1a0] sm:$0xff] %v776_v39  ;;  %1319 = vmatmul.msk.f32.gmra.mxu0 %vm258_vm0, %v195_v37 }
 0x161   : > { %1447 = vmatmul.msk.f32.gmra.mxu2 %vm258_vm0, %v195_v37 }
 0x162   : > { %1383 = vmatmul.msk.f32.gmra.mxu1 %vm258_vm0, %v195_v37 }
 0x163   : > { %v848_v0 = vpop.f32.mrf.mxu3 }
 0x164   : > { %v937_v40 = vpop.f32.mrf.mxu2  ;;  %1154 = vst [vmem:[%s2113_s3 + $0x3e0] sm:$0xff] %v848_v0 }
 0x165   : > { %1083 = vst [vmem:[%s2113_s3 + $0x1a8] sm:$0xff] %v937_v40  ;;  %v618_v42 = vpop.f32.mrf.mxu0 }
 0x166   : > { %1084 = vst [vmem:[%s2113_s3 + $0x1b0] sm:$0xff] %v618_v42 }
 0x167   : > { %v779_v43 = vpop.f32.mrf.mxu1 }
 0x168   : > { %1460 = vmatmul.msk.f32.gmra.mxu3 %vm258_vm0, %v2046_v4  ;;  %1085 = vst [vmem:[%s2113_s3 + $0x1b8] sm:$0xff] %v779_v43  ;;  %1320 = vmatmul.msk.f32.gmra.mxu0 %vm258_vm0, %v196_v41 }
 0x169   : > { %1448 = vmatmul.msk.f32.gmra.mxu2 %vm258_vm0, %v196_v41 }
 0x16a   : > { %1384 = vmatmul.msk.f32.gmra.mxu1 %vm258_vm0, %v196_v41 }
 0x16b   : > { %v851_v1 = vpop.f32.mrf.mxu3 }
 0x16c   : > { %v940_v44 = vpop.f32.mrf.mxu2  ;;  %1157 = vst [vmem:[%s2113_s3 + $0x3f8] sm:$0xff] %v851_v1 }
 0x16d   : > { %1086 = vst [vmem:[%s2113_s3 + $0x1c0] sm:$0xff] %v940_v44  ;;  %v621_v46 = vpop.f32.mrf.mxu0 }
 0x16e   : > { %1087 = vst [vmem:[%s2113_s3 + $0x1c8] sm:$0xff] %v621_v46 }
 0x16f   : > { %v782_v47 = vpop.f32.mrf.mxu1 }
 0x170   : > { %1461 = vmatmul.msk.f32.gmra.mxu3 %vm258_vm0, %v2059_v6  ;;  %1088 = vst [vmem:[%s2113_s3 + $0x1d0] sm:$0xff] %v782_v47  ;;  %1321 = vmatmul.msk.f32.gmra.mxu0 %vm258_vm0, %v197_v45 }
 0x171   : > { %1449 = vmatmul.msk.f32.gmra.mxu2 %vm258_vm0, %v197_v45 }
 0x172   : > { %1385 = vmatmul.msk.f32.gmra.mxu1 %vm258_vm0, %v197_v45 }
 0x173   : > { %v854_v4 = vpop.f32.mrf.mxu3 }
 0x174   : > { %v943_v49 = vpop.f32.mrf.mxu2  ;;  %1160 = vst [vmem:[%s2113_s3 + $0x410] sm:$0xff] %v854_v4 }
 0x175   : > { %1089 = vst [vmem:[%s2113_s3 + $0x1d8] sm:$0xff] %v943_v49  ;;  %v624_v51 = vpop.f32.mrf.mxu0 }
 0x176   : > { %1090 = vst [vmem:[%s2113_s3 + $0x1e0] sm:$0xff] %v624_v51 }
 0x177   : > { %v785_v53 = vpop.f32.mrf.mxu1 }
 0x178   : > { %1091 = vst [vmem:[%s2113_s3 + $0x1e8] sm:$0xff] %v785_v53 }
 0x17b   : > { %v857_v6 = vpop.f32.mrf.mxu3 }
 0x17c   : > { %v946_v55 = vpop.f32.mrf.mxu2  ;;  %1163 = vst [vmem:[%s2113_s3 + $0x428] sm:$0xff] %v857_v6 }
 0x17d   : > { %1092 = vst [vmem:[%s2113_s3 + $0x1f0] sm:$0xff] %v946_v55  ;;  %v627_v57 = vpop.f32.mrf.mxu0 }
 0x17e   : > { %1093 = vst [vmem:[%s2113_s3 + $0x1f8] sm:$0xff] %v627_v57 }
 0x17f   : > { %v788_v59 = vpop.f32.mrf.mxu1 }
 0x180   : > { %1094 = vst [vmem:[%s2113_s3 + $0x200] sm:$0xff] %v788_v59 }
 0x183   : > { %v860_v61 = vpop.f32.mrf.mxu3 }
 0x184   : > { %v949_v63 = vpop.f32.mrf.mxu2  ;;  %1166 = vst [vmem:[%s2113_s3 + $0x440] sm:$0xff] %v860_v61 }
 0x185   : > { %1095 = vst [vmem:[%s2113_s3 + $0x208] sm:$0xff] %v949_v63  ;;  %v630_v2 = vpop.f32.mrf.mxu0 }
 0x186   : > { %1096 = vst [vmem:[%s2113_s3 + $0x210] sm:$0xff] %v630_v2 }
 0x187   : > { %v791_v3 = vpop.f32.mrf.mxu1 }
 0x188   : > { %1097 = vst [vmem:[%s2113_s3 + $0x218] sm:$0xff] %v791_v3 }
 0x18b   : > { %v863_v5 = vpop.f32.mrf.mxu3 }
 0x18c   : > { %v952_v7 = vpop.f32.mrf.mxu2  ;;  %1169 = vst [vmem:[%s2113_s3 + $0x458] sm:$0xff] %v863_v5 }
 0x18d   : > { %1098 = vst [vmem:[%s2113_s3 + $0x220] sm:$0xff] %v952_v7  ;;  %v633_v48 = vpop.f32.mrf.mxu0 }
 0x18e   : > { %1099 = vst [vmem:[%s2113_s3 + $0x228] sm:$0xff] %v633_v48 }
 0x18f   : > { %v794_v8 = vpop.f32.mrf.mxu1 }
 0x190   : > { %1100 = vst [vmem:[%s2113_s3 + $0x230] sm:$0xff] %v794_v8 }
 0x193   : > { %v866_v9 = vpop.f32.mrf.mxu3 }
 0x194   : > { %v955_v10 = vpop.f32.mrf.mxu2  ;;  %1172 = vst [vmem:[%s2113_s3 + $0x470] sm:$0xff] %v866_v9 }
 0x195   : > { %1101 = vst [vmem:[%s2113_s3 + $0x238] sm:$0xff] %v955_v10  ;;  %v636_v11 = vpop.f32.mrf.mxu0 }
 0x196   : > { %1102 = vst [vmem:[%s2113_s3 + $0x240] sm:$0xff] %v636_v11 }
 0x197   : > { %v797_v50 = vpop.f32.mrf.mxu1 }
 0x198   : > { %1103 = vst [vmem:[%s2113_s3 + $0x248] sm:$0xff] %v797_v50 }
 0x19b   : > { %v994_v13 = vpop.f32.mrf.mxu3 }
 0x19c   : > { %v958_v12 = vpop.f32.mrf.mxu2  ;;  %1140 = vst [vmem:[%s2113_s3 + $0x370] sm:$0xff] %v994_v13 }
 0x19d   : > { %1104 = vst [vmem:[%s2113_s3 + $0x250] sm:$0xff] %v958_v12  ;;  %v639_v14 = vpop.f32.mrf.mxu0 }
 0x19e   : > { %1105 = vst [vmem:[%s2113_s3 + $0x258] sm:$0xff] %v639_v14 }
 0x19f   : > { %v800_v15 = vpop.f32.mrf.mxu1 }
 0x1a0   : > { %1106 = vst [vmem:[%s2113_s3 + $0x260] sm:$0xff] %v800_v15 }
 0x1a3   : > { %v997_v16 = vpop.f32.mrf.mxu3 }
 0x1a4   : > { %v961_v52 = vpop.f32.mrf.mxu2  ;;  %1143 = vst [vmem:[%s2113_s3 + $0x388] sm:$0xff] %v997_v16 }
 0x1a5   : > { %1107 = vst [vmem:[%s2113_s3 + $0x268] sm:$0xff] %v961_v52  ;;  %v642_v17 = vpop.f32.mrf.mxu0 }
 0x1a6   : > { %1108 = vst [vmem:[%s2113_s3 + $0x270] sm:$0xff] %v642_v17 }
 0x1a7   : > { %v803_v18 = vpop.f32.mrf.mxu1 }
 0x1a8   : > { %1109 = vst [vmem:[%s2113_s3 + $0x278] sm:$0xff] %v803_v18 }
 0x1ab   : > { %v1000_v54 = vpop.f32.mrf.mxu3 }
 0x1ac   : > { %v964_v19 = vpop.f32.mrf.mxu2  ;;  %1146 = vst [vmem:[%s2113_s3 + $0x3a0] sm:$0xff] %v1000_v54 }
 0x1ad   : > { %1110 = vst [vmem:[%s2113_s3 + $0x280] sm:$0xff] %v964_v19  ;;  %v645_v20 = vpop.f32.mrf.mxu0 }
 0x1ae   : > { %1111 = vst [vmem:[%s2113_s3 + $0x288] sm:$0xff] %v645_v20 }
 0x1af   : > { %v806_v21 = vpop.f32.mrf.mxu1 }
 0x1b0   : > { %1112 = vst [vmem:[%s2113_s3 + $0x290] sm:$0xff] %v806_v21 }
 0x1b3   : > { %v1003_v23 = vpop.f32.mrf.mxu3 }
 0x1b4   : > { %v967_v22 = vpop.f32.mrf.mxu2  ;;  %1149 = vst [vmem:[%s2113_s3 + $0x3b8] sm:$0xff] %v1003_v23 }
 0x1b5   : > { %1113 = vst [vmem:[%s2113_s3 + $0x298] sm:$0xff] %v967_v22  ;;  %v648_v56 = vpop.f32.mrf.mxu0 }
 0x1b6   : > { %1114 = vst [vmem:[%s2113_s3 + $0x2a0] sm:$0xff] %v648_v56 }
 0x1b7   : > { %v809_v24 = vpop.f32.mrf.mxu1 }
 0x1b8   : > { %1115 = vst [vmem:[%s2113_s3 + $0x2a8] sm:$0xff] %v809_v24 }
 0x1bb   : > { %v1006_v26 = vpop.f32.mrf.mxu3 }
 0x1bc   : > { %v970_v25 = vpop.f32.mrf.mxu2  ;;  %1152 = vst [vmem:[%s2113_s3 + $0x3d0] sm:$0xff] %v1006_v26 }
 0x1bd   : > { %1116 = vst [vmem:[%s2113_s3 + $0x2b0] sm:$0xff] %v970_v25  ;;  %v651_v27 = vpop.f32.mrf.mxu0 }
 0x1be   : > { %1117 = vst [vmem:[%s2113_s3 + $0x2b8] sm:$0xff] %v651_v27 }
 0x1bf   : > { %v812_v58 = vpop.f32.mrf.mxu1 }
 0x1c0   : > { %1118 = vst [vmem:[%s2113_s3 + $0x2c0] sm:$0xff] %v812_v58 }
 0x1c3   : > { %v1009_v29 = vpop.f32.mrf.mxu3 }
 0x1c4   : > { %v973_v28 = vpop.f32.mrf.mxu2  ;;  %1155 = vst [vmem:[%s2113_s3 + $0x3e8] sm:$0xff] %v1009_v29 }
 0x1c5   : > { %1119 = vst [vmem:[%s2113_s3 + $0x2c8] sm:$0xff] %v973_v28  ;;  %v654_v30 = vpop.f32.mrf.mxu0 }
 0x1c6   : > { %1120 = vst [vmem:[%s2113_s3 + $0x2d0] sm:$0xff] %v654_v30 }
 0x1c7   : > { %v815_v31 = vpop.f32.mrf.mxu1 }
 0x1c8   : > { %1121 = vst [vmem:[%s2113_s3 + $0x2d8] sm:$0xff] %v815_v31 }
 0x1cb   : > { %v1012_v32 = vpop.f32.mrf.mxu3 }
 0x1cc   : > { %v976_v60 = vpop.f32.mrf.mxu2  ;;  %1158 = vst [vmem:[%s2113_s3 + $0x400] sm:$0xff] %v1012_v32 }
 0x1cd   : > { %1122 = vst [vmem:[%s2113_s3 + $0x2e0] sm:$0xff] %v976_v60  ;;  %v657_v33 = vpop.f32.mrf.mxu0 }
 0x1ce   : > { %1123 = vst [vmem:[%s2113_s3 + $0x2e8] sm:$0xff] %v657_v33 }
 0x1cf   : > { %v818_v34 = vpop.f32.mrf.mxu1 }
 0x1d0   : > { %1124 = vst [vmem:[%s2113_s3 + $0x2f0] sm:$0xff] %v818_v34 }
 0x1d3   : > { %v1015_v62 = vpop.f32.mrf.mxu3 }
 0x1d4   : > { %v979_v35 = vpop.f32.mrf.mxu2  ;;  %1161 = vst [vmem:[%s2113_s3 + $0x418] sm:$0xff] %v1015_v62 }
 0x1d5   : > { %1125 = vst [vmem:[%s2113_s3 + $0x2f8] sm:$0xff] %v979_v35  ;;  %v660_v36 = vpop.f32.mrf.mxu0 }
 0x1d6   : > { %1126 = vst [vmem:[%s2113_s3 + $0x300] sm:$0xff] %v660_v36 }
 0x1d7   : > { %v821_v37 = vpop.f32.mrf.mxu1 }
 0x1d8   : > { %1127 = vst [vmem:[%s2113_s3 + $0x308] sm:$0xff] %v821_v37 }
 0x1db   : > { %v1018_v39 = vpop.f32.mrf.mxu3 }
 0x1dc   : > { %v982_v38 = vpop.f32.mrf.mxu2  ;;  %1164 = vst [vmem:[%s2113_s3 + $0x430] sm:$0xff] %v1018_v39 }
 0x1dd   : > { %1128 = vst [vmem:[%s2113_s3 + $0x310] sm:$0xff] %v982_v38  ;;  %v663_v0 = vpop.f32.mrf.mxu0 }
 0x1de   : > { %1129 = vst [vmem:[%s2113_s3 + $0x318] sm:$0xff] %v663_v0 }
 0x1df   : > { %v824_v40 = vpop.f32.mrf.mxu1 }
 0x1e0   : > { %1130 = vst [vmem:[%s2113_s3 + $0x320] sm:$0xff] %v824_v40 }
 0x1e3   : > { %v1021_v42 = vpop.f32.mrf.mxu3 }
 0x1e4   : > { %v985_v41 = vpop.f32.mrf.mxu2  ;;  %1167 = vst [vmem:[%s2113_s3 + $0x448] sm:$0xff] %v1021_v42 }
 0x1e5   : > { %1131 = vst [vmem:[%s2113_s3 + $0x328] sm:$0xff] %v985_v41  ;;  %v666_v43 = vpop.f32.mrf.mxu0 }
 0x1e6   : > { %1132 = vst [vmem:[%s2113_s3 + $0x330] sm:$0xff] %v666_v43 }
 0x1e7   : > { %v827_v1 = vpop.f32.mrf.mxu1 }
 0x1e8   : > { %1133 = vst [vmem:[%s2113_s3 + $0x338] sm:$0xff] %v827_v1 }
 0x1eb   : > { %v1024_v45 = vpop.f32.mrf.mxu3 }
 0x1ec   : > { %v988_v44 = vpop.f32.mrf.mxu2  ;;  %1170 = vst [vmem:[%s2113_s3 + $0x460] sm:$0xff] %v1024_v45 }
 0x1ed   : > { %1134 = vst [vmem:[%s2113_s3 + $0x340] sm:$0xff] %v988_v44  ;;  %v669_v46 = vpop.f32.mrf.mxu0 }
 0x1ee   : > { %1135 = vst [vmem:[%s2113_s3 + $0x348] sm:$0xff] %v669_v46 }
 0x1ef   : > { %v830_v47 = vpop.f32.mrf.mxu1 }
 0x1f0   : > { %1136 = vst [vmem:[%s2113_s3 + $0x350] sm:$0xff] %v830_v47 }
 0x1f3   : > { %v1027_v49 = vpop.f32.mrf.mxu3 }
 0x1f4   : > { %v991_v4 = vpop.f32.mrf.mxu2  ;;  %1173 = vst [vmem:[%s2113_s3 + $0x478] sm:$0xff] %v1027_v49 }
 0x1f5   : > { %1137 = vst [vmem:[%s2113_s3 + $0x358] sm:$0xff] %v991_v4 }
 0x1f6   : > { %1584 = shalt.err (!%p1581_p3)
}
 0x1f7   : > { %s1621_s26 = smov 384   ;;  %s1622_s27 = smov 24  }
 0x1f8   : > { %1516 = dma.vmem_to_hbm [thread:$0]  (%p1676_p5), %s1188_s8, 18432, %s1190_s14, %s1175_s13, %s1621_s26, %s1621_s26, %s1622_s27  }
 0x1f9 PF: > { %p1522_p4 = scmp.ge.s32.totalorder %s1619_s12, 2  ;;  %s1204_s28 = sand.u32 1, %s1607_s9  }
 0x1fa   : > { %s1205_s29 = scalar_lea.sflag [#allocation3], %s1204_s28 }
 0x1fb   : > { %p1519_p7 = pnand %p1522_p4, %p1680_p6 }
 0x1fd   : > { %p1520_p8 = pneg %p1519_p7 }
 0x1ff   : > { %1602 = dma.done.wait (%p1520_p8), %s1205_s29, 18432  }
 0x200   : > { %1604 = vsyncadd (%p1520_p8), %s1205_s29, 4294948864  ;;  %p12_p9 = scmp.ge.s32.totalorder %s1663_s15, 6   ;;  %s2417_s9 = smov %s1611_s10 }
 0x201   : > { %s2418_s10 = smov %s1615_s11  ;;  %s2419_s11 = smov %s1674_s18 }
 0x202   : > { %s2420_s12 = smov %s1663_s15  ;;  %14 = sbr.rel (!%p12_p9) target bundleno = 3 (0x3), region = 66 }
 0x207   :  { %1211 = vsyncpa [#allocation3], 1 }
 0x208   :  { %1213 = vsyncpa [#allocation3 + $0x1], 1 }

</bundles_post_ra>
